<compile_context>
chip_gen: v6e
topology: v6e:2x2x1
jax: 0.10.0
libtpu: 0.0.40
codegen_flags: <defaults>
</compile_context>

<pallas_src>
import jax
import jax.numpy as jnp
from jax import lax
from jax.experimental import pallas as pl
from jax.experimental.pallas import tpu as pltpu


def _fullmodel_kernel(x_ref, lab_ref, w_ref, b_ref,
                      out_aux_ref, out_main_ref, stats_ref):
    # stats lanes: [0]=ce_sum_aux [1]=ce_sum_main [2]=valid/pixel count [3]=correct
    # One (8,128) stats block per batch index n (resident across the pixel axis);
    # the wrapper sums over n, so the leading grid axis can be "parallel".
    @pl.when(pl.program_id(1) == 0)
    def _():
        stats_ref[...] = jnp.zeros_like(stats_ref)

    x = x_ref[0, :, :]                # (C, T) f32, pixels in lanes
    lab = lab_ref[0, :, :]            # (1, T) i32

    # Both 1x1-conv heads in a single MXU matmul: (2*NC, C) @ (C, T) -> (2*NC, T)
    logits = jnp.dot(w_ref[...], x, preferred_element_type=jnp.float32) + b_ref[...]
    nc2, t = logits.shape
    nc = nc2 // 2
    logits_aux = logits[:nc, :]       # sublane-aligned static slices
    logits_main = logits[nc:, :]

    out_aux_ref[0, :, :] = logits_aux     # lane-dense stores (T multiple of 128)
    out_main_ref[0, :, :] = logits_main

    cls_idx = lax.broadcasted_iota(jnp.int32, (nc, t), 0)
    valid = (lab >= 0).astype(jnp.float32)      # (1, T)
    onehot = cls_idx == lab                     # (NC, T)

    m_main = jnp.max(logits_main, axis=0, keepdims=True)   # shared: CE + argmax

    def ce_sum(l, m):
        sh = l - m
        lse = jnp.log(jnp.sum(jnp.exp(sh), axis=0, keepdims=True))
        tgt = jnp.sum(jnp.where(onehot, sh, 0.0), axis=0, keepdims=True)
        return jnp.sum((lse - tgt) * valid)

    ce_a = ce_sum(logits_aux, jnp.max(logits_aux, axis=0, keepdims=True))
    ce_m = ce_sum(logits_main, m_main)
    vcount = jnp.sum(valid)

    # argmax over classes (first-max tie-break, matches torch.max semantics)
    preds = jnp.min(jnp.where(logits_main == m_main, cls_idx, nc),
                    axis=0, keepdims=True)
    correct = jnp.sum(valid * (preds == lab).astype(jnp.float32))

    lane = lax.broadcasted_iota(jnp.int32, (1, 8, 128), 2)
    contrib = (jnp.where(lane == 0, ce_a, 0.0)
               + jnp.where(lane == 1, ce_m, 0.0)
               + jnp.where(lane == 2, vcount, 0.0)
               + jnp.where(lane == 3, correct, 0.0))
    stats_ref[...] += contrib


def fullmodel_forward(x_nchw, labels, w_aux, b_aux, w_main, b_main, *, tile=None):
    N, C, H, W = x_nchw.shape
    NC = w_main.shape[1]
    HW = H * W

    if tile is None:
        # Biggest lane-dense tile that divides H*W (per-step overhead ~0.35us);
        # at these C/NC even tile=2048 is only a few hundred KiB of double-buffered
        # VMEM, so it fits v5e/v6e (128 MiB) and v7x (64 MiB) without raising limits.
        tile = HW
        for cand in (2048, 1024, 512, 256, 128):
            if HW % cand == 0:
                tile = cand
                break
    assert HW % tile == 0 and (tile % 128 == 0 or tile == HW)

    # NCHW-native: no transpose passes, reshapes below are pure bitcasts.
    x_rows = x_nchw.reshape(N, C, HW).astype(jnp.float32)
    lab3d = labels.reshape(N, 1, HW).astype(jnp.int32)
    # Merged head: aux rows first, main rows second.
    w_cat = jnp.concatenate([w_aux.T, w_main.T], axis=0).astype(jnp.float32)      # (2NC, C)
    b_cat = jnp.concatenate([b_aux.reshape(NC, 1), b_main.reshape(NC, 1)],
                            axis=0).astype(jnp.float32)                           # (2NC, 1)

    grid = (N, HW // tile)

    logits_aux, logits_main, stats = pl.pallas_call(
        _fullmodel_kernel,
        out_shape=(
            jax.ShapeDtypeStruct((N, NC, HW), jnp.float32),
            jax.ShapeDtypeStruct((N, NC, HW), jnp.float32),
            jax.ShapeDtypeStruct((N, 8, 128), jnp.float32),
        ),
        grid_spec=pltpu.PrefetchScalarGridSpec(
            num_scalar_prefetch=0,
            grid=grid,
            in_specs=[
                pl.BlockSpec((1, C, tile), lambda n, j: (n, 0, j)),
                pl.BlockSpec((1, 1, tile), lambda n, j: (n, 0, j)),
                pl.BlockSpec((2 * NC, C), lambda n, j: (0, 0)),
                pl.BlockSpec((2 * NC, 1), lambda n, j: (0, 0)),
            ],
            out_specs=[
                pl.BlockSpec((1, NC, tile), lambda n, j: (n, 0, j)),
                pl.BlockSpec((1, NC, tile), lambda n, j: (n, 0, j)),
                pl.BlockSpec((1, 8, 128), lambda n, j: (n, 0, 0)),  # per-n resident stats
            ],
        ),
        compiler_params=pltpu.CompilerParams(
            # Pixel axis is a reduction into the per-n stats block -> "arbitrary";
            # batch axis is independent (own stats row) -> "parallel" (v7x megacore).
            dimension_semantics=("parallel", "arbitrary"),
        ),
    )(x_rows, lab3d, w_cat, b_cat)

    s = jnp.sum(stats[:, 0, :], axis=0)
    # loss = 0.4 * mean-CE(aux) + 1.0 * mean-CE(main), mean over valid pixels
    loss = (0.4 * s[0] + 1.0 * s[1]) / s[2]
    acc = s[3] / (s[2] + 1e-10)

    outputs = (logits_aux.reshape(N, NC, H, W),      # bitcast reshape, no transpose
               logits_main.reshape(N, NC, H, W))
    # TODO(synk): F.interpolate(bilinear) branch of pixel_acc is skipped since the
    # synthetic heads already produce logits at label resolution.
    return jnp.expand_dims(loss, 0), outputs, acc


if __name__ == "__main__":
    N, C, H, W, NC = 2, 4, 16, 16, 8

    key = jax.random.PRNGKey(0)
    kx, kl, k1, k2, k3, k4 = jax.random.split(key, 6)
    x = jax.random.normal(kx, (N, C, H, W), dtype=jnp.float32)
    # labels in [-1, NC-1]; -1 is the ignore label
    labels = jax.random.randint(kl, (N, H, W), -1, NC).astype(jnp.int32)

    w_aux = (0.1 * jax.random.normal(k1, (C, NC))).astype(jnp.float32)
    b_aux = (0.01 * jax.random.normal(k2, (1, NC))).astype(jnp.float32)
    w_main = (0.1 * jax.random.normal(k3, (C, NC))).astype(jnp.float32)
    b_main = (0.01 * jax.random.normal(k4, (1, NC))).astype(jnp.float32)

    loss, outputs, acc = fullmodel_forward(x, labels, w_aux, b_aux, w_main, b_main)
    jax.block_until_ready((loss, outputs, acc))

    assert loss.shape == (1,)
    assert outputs[0].shape == (N, NC, H, W) and outputs[1].shape == (N, NC, H, W)
    assert acc.shape == ()
    print("KERNEL_OK")
</pallas_src>

<mosaic_0001>
module attributes {stable_mosaic.version = 11 : i64} {
  func.func @_fullmodel_kernel(%arg0: i32, %arg1: i32, %arg2: memref<1x4x256xf32, #tpu.memory_space<vmem>>, %arg3: memref<1x1x256xi32, #tpu.memory_space<vmem>>, %arg4: memref<16x4xf32, #tpu.memory_space<vmem>>, %arg5: memref<16x1xf32, #tpu.memory_space<vmem>>, %arg6: memref<1x8x256xf32, #tpu.memory_space<vmem>>, %arg7: memref<1x8x256xf32, #tpu.memory_space<vmem>>, %arg8: memref<1x8x128xf32, #tpu.memory_space<vmem>>) attributes {dimension_semantics = [#tpu.dimension_semantics<parallel>, #tpu.dimension_semantics<arbitrary>], iteration_bounds = array<i64: 2, 1>, scalar_prefetch = 0 : i64, scratch_operands = 0 : i64, tpu.core_type = #tpu.core_type<tc>, window_params = [{transform_indices = @transform_0, window_bounds = array<i64: 1, 4, 256>}, {transform_indices = @transform_1, window_bounds = array<i64: 1, 1, 256>}, {pipeline_mode = #tpu.pipeline_mode<synchronous>, transform_indices = @transform_2, window_bounds = array<i64: 16, 4>}, {pipeline_mode = #tpu.pipeline_mode<synchronous>, transform_indices = @transform_3, window_bounds = array<i64: 16, 1>}, {transform_indices = @transform_4, window_bounds = array<i64: 1, 8, 256>}, {transform_indices = @transform_5, window_bounds = array<i64: 1, 8, 256>}, {transform_indices = @transform_6, window_bounds = array<i64: 1, 8, 128>}]} {
    %c0_i32 = arith.constant 0 : i32
    %0 = arith.cmpi eq, %arg1, %c0_i32 : i32
    %1 = arith.extui %0 : i1 to i32
    %c0_i32_0 = arith.constant 0 : i32
    %2 = arith.cmpi ne, %1, %c0_i32_0 : i32
    scf.if %2 {
      %cst_41 = arith.constant 0.000000e+00 : f32
      %108 = vector.broadcast %cst_41 : f32 to vector<1x8x128xf32>
      %c0_42 = arith.constant 0 : index
      %c0_43 = arith.constant 0 : index
      %c0_44 = arith.constant 0 : index
      %109 = vector.load %arg8[%c0_42, %c0_43, %c0_44] : memref<1x8x128xf32, #tpu.memory_space<vmem>>, vector<1x8x128xf32>
      tpu.vector_store %arg8[%c0_42, %c0_43, %c0_44], %108 {strides = array<i32>} : memref<1x8x128xf32, #tpu.memory_space<vmem>>, vector<1x8x128xf32>,
    } else {
    }
    %c0 = arith.constant 0 : index
    %c0_1 = arith.constant 0 : index
    %c0_2 = arith.constant 0 : index
    %3 = vector.load %arg2[%c0, %c0_1, %c0_2] : memref<1x4x256xf32, #tpu.memory_space<vmem>>, vector<1x4x256xf32>
    %4 = vector.shape_cast %3 : vector<1x4x256xf32> to vector<4x256xf32>
    %c0_3 = arith.constant 0 : index
    %c0_4 = arith.constant 0 : index
    %c0_5 = arith.constant 0 : index
    %5 = vector.load %arg3[%c0_3, %c0_4, %c0_5] : memref<1x1x256xi32, #tpu.memory_space<vmem>>, vector<1x1x256xi32>
    %6 = vector.shape_cast %5 : vector<1x1x256xi32> to vector<1x256xi32>
    %c0_6 = arith.constant 0 : index
    %c0_7 = arith.constant 0 : index
    %7 = vector.load %arg4[%c0_6, %c0_7] : memref<16x4xf32, #tpu.memory_space<vmem>>, vector<16x4xf32>
    %cst = arith.constant dense<0.000000e+00> : vector<16x256xf32>
    %8 = tpu.matmul %7, %4, %cst {dimension_numbers = #tpu.dot_dimension_numbers<[1], [0], [0], [1], [0, 0, 1, 1], [], []>} : vector<16x4xf32>, vector<4x256xf32>, vector<16x256xf32> -> vector<16x256xf32>
    %c0_8 = arith.constant 0 : index
    %c0_9 = arith.constant 0 : index
    %9 = vector.load %arg5[%c0_8, %c0_9] : memref<16x1xf32, #tpu.memory_space<vmem>>, vector<16x1xf32>
    %10 = vector.broadcast %9 : vector<16x1xf32> to vector<16x256xf32>
    %11 = arith.addf %8, %10 : vector<16x256xf32>
    %12 = vector.extract_strided_slice %11 {offsets = [0, 0], sizes = [8, 256], strides = [1, 1]} : vector<16x256xf32> to vector<8x256xf32>
    %13 = vector.extract_strided_slice %11 {offsets = [8, 0], sizes = [8, 256], strides = [1, 1]} : vector<16x256xf32> to vector<8x256xf32>
    %c0_10 = arith.constant 0 : index
    %c0_11 = arith.constant 0 : index
    %c0_12 = arith.constant 0 : index
    %14 = vector.load %arg6[%c0_10, %c0_11, %c0_12] : memref<1x8x256xf32, #tpu.memory_space<vmem>>, vector<1x8x256xf32>
    %15 = vector.shape_cast %14 : vector<1x8x256xf32> to vector<8x256xf32>
    %16 = vector.shape_cast %12 : vector<8x256xf32> to vector<1x8x256xf32>
    tpu.vector_store %arg6[%c0_10, %c0_11, %c0_12], %16 {strides = array<i32>} : memref<1x8x256xf32, #tpu.memory_space<vmem>>, vector<1x8x256xf32>,
    %c0_13 = arith.constant 0 : index
    %c0_14 = arith.constant 0 : index
    %c0_15 = arith.constant 0 : index
    %17 = vector.load %arg7[%c0_13, %c0_14, %c0_15] : memref<1x8x256xf32, #tpu.memory_space<vmem>>, vector<1x8x256xf32>
    %18 = vector.shape_cast %17 : vector<1x8x256xf32> to vector<8x256xf32>
    %19 = vector.shape_cast %13 : vector<8x256xf32> to vector<1x8x256xf32>
    tpu.vector_store %arg7[%c0_13, %c0_14, %c0_15], %19 {strides = array<i32>} : memref<1x8x256xf32, #tpu.memory_space<vmem>>, vector<1x8x256xf32>,
    %20 = tpu.iota {dimensions = array<i32: 0>} : vector<8x256xi32>
    %c0_i32_16 = arith.constant 0 : i32
    %21 = vector.broadcast %c0_i32_16 : i32 to vector<1x256xi32>
    %22 = arith.cmpi sge, %6, %21 : vector<1x256xi32>
    %23 = arith.extui %22 : vector<1x256xi1> to vector<1x256xi32>
    %24 = arith.sitofp %23 : vector<1x256xi32> to vector<1x256xf32>
    %25 = vector.broadcast %6 : vector<1x256xi32> to vector<8x256xi32>
    %26 = arith.cmpi eq, %20, %25 : vector<8x256xi32>
    %cst_17 = arith.constant dense<0xFF800000> : vector<256xf32>
    %27 = vector.multi_reduction <maximumf>, %13, %cst_17 [0] : vector<8x256xf32> to vector<256xf32>
    %28 = vector.shape_cast %27 : vector<256xf32> to vector<1x256xf32>
    %cst_18 = arith.constant dense<0xFF800000> : vector<256xf32>
    %29 = vector.multi_reduction <maximumf>, %12, %cst_18 [0] : vector<8x256xf32> to vector<256xf32>
    %30 = vector.shape_cast %29 : vector<256xf32> to vector<1x256xf32>
    %31 = vector.broadcast %30 : vector<1x256xf32> to vector<8x256xf32>
    %32 = arith.subf %12, %31 : vector<8x256xf32>
    %33 = math.exp %32 : vector<8x256xf32>
    %cst_19 = arith.constant dense<0.000000e+00> : vector<256xf32>
    %34 = vector.multi_reduction <add>, %33, %cst_19 [0] : vector<8x256xf32> to vector<256xf32>
    %35 = vector.shape_cast %34 : vector<256xf32> to vector<1x256xf32>
    %36 = math.log %35 : vector<1x256xf32>
    %cst_20 = arith.constant 0.000000e+00 : f32
    %37 = vector.broadcast %cst_20 : f32 to vector<8x256xf32>
    %38 = arith.select %26, %32, %37 : vector<8x256xi1>, vector<8x256xf32>
    %cst_21 = arith.constant dense<0.000000e+00> : vector<256xf32>
    %39 = vector.multi_reduction <add>, %38, %cst_21 [0] : vector<8x256xf32> to vector<256xf32>
    %40 = vector.shape_cast %39 : vector<256xf32> to vector<1x256xf32>
    %41 = arith.subf %36, %40 : vector<1x256xf32>
    %42 = arith.mulf %41, %24 : vector<1x256xf32>
    %43 = vector.shape_cast %42 : vector<1x256xf32> to vector<1x1x256xf32>
    %cst_22 = arith.constant dense<0.000000e+00> : vector<1xf32>
    %44 = vector.multi_reduction <add>, %43, %cst_22 [1, 2] : vector<1x1x256xf32> to vector<1xf32>
    %45 = vector.shape_cast %44 : vector<1xf32> to vector<1x1x1xf32>
    %46 = vector.extract %45[0, 0, 0] : f32 from vector<1x1x1xf32>
    %47 = vector.broadcast %28 : vector<1x256xf32> to vector<8x256xf32>
    %48 = arith.subf %13, %47 : vector<8x256xf32>
    %49 = math.exp %48 : vector<8x256xf32>
    %cst_23 = arith.constant dense<0.000000e+00> : vector<256xf32>
    %50 = vector.multi_reduction <add>, %49, %cst_23 [0] : vector<8x256xf32> to vector<256xf32>
    %51 = vector.shape_cast %50 : vector<256xf32> to vector<1x256xf32>
    %52 = math.log %51 : vector<1x256xf32>
    %cst_24 = arith.constant 0.000000e+00 : f32
    %53 = vector.broadcast %cst_24 : f32 to vector<8x256xf32>
    %54 = arith.select %26, %48, %53 : vector<8x256xi1>, vector<8x256xf32>
    %cst_25 = arith.constant dense<0.000000e+00> : vector<256xf32>
    %55 = vector.multi_reduction <add>, %54, %cst_25 [0] : vector<8x256xf32> to vector<256xf32>
    %56 = vector.shape_cast %55 : vector<256xf32> to vector<1x256xf32>
    %57 = arith.subf %52, %56 : vector<1x256xf32>
    %58 = arith.mulf %57, %24 : vector<1x256xf32>
    %59 = vector.shape_cast %58 : vector<1x256xf32> to vector<1x1x256xf32>
    %cst_26 = arith.constant dense<0.000000e+00> : vector<1xf32>
    %60 = vector.multi_reduction <add>, %59, %cst_26 [1, 2] : vector<1x1x256xf32> to vector<1xf32>
    %61 = vector.shape_cast %60 : vector<1xf32> to vector<1x1x1xf32>
    %62 = vector.extract %61[0, 0, 0] : f32 from vector<1x1x1xf32>
    %63 = vector.shape_cast %24 : vector<1x256xf32> to vector<1x1x256xf32>
    %cst_27 = arith.constant dense<0.000000e+00> : vector<1xf32>
    %64 = vector.multi_reduction <add>, %63, %cst_27 [1, 2] : vector<1x1x256xf32> to vector<1xf32>
    %65 = vector.shape_cast %64 : vector<1xf32> to vector<1x1x1xf32>
    %66 = vector.extract %65[0, 0, 0] : f32 from vector<1x1x1xf32>
    %67 = vector.broadcast %28 : vector<1x256xf32> to vector<8x256xf32>
    %68 = arith.cmpf oeq, %13, %67 : vector<8x256xf32>
    %c8_i32 = arith.constant 8 : i32
    %69 = vector.broadcast %c8_i32 : i32 to vector<8x256xi32>
    %70 = arith.select %68, %20, %69 : vector<8x256xi1>, vector<8x256xi32>
    %cst_28 = arith.constant dense<2147483647> : vector<256xi32>
    %71 = vector.multi_reduction <minsi>, %70, %cst_28 [0] : vector<8x256xi32> to vector<256xi32>
    %72 = vector.shape_cast %71 : vector<256xi32> to vector<1x256xi32>
    %73 = arith.cmpi eq, %72, %6 : vector<1x256xi32>
    %74 = arith.extui %73 : vector<1x256xi1> to vector<1x256xi32>
    %75 = arith.sitofp %74 : vector<1x256xi32> to vector<1x256xf32>
    %76 = arith.mulf %24, %75 : vector<1x256xf32>
    %77 = vector.shape_cast %76 : vector<1x256xf32> to vector<1x1x256xf32>
    %cst_29 = arith.constant dense<0.000000e+00> : vector<1xf32>
    %78 = vector.multi_reduction <add>, %77, %cst_29 [1, 2] : vector<1x1x256xf32> to vector<1xf32>
    %79 = vector.shape_cast %78 : vector<1xf32> to vector<1x1x1xf32>
    %80 = vector.extract %79[0, 0, 0] : f32 from vector<1x1x1xf32>
    %81 = tpu.iota {dimensions = array<i32: 2>} : vector<1x8x128xi32>
    %c0_i32_30 = arith.constant 0 : i32
    %82 = vector.broadcast %c0_i32_30 : i32 to vector<1x8x128xi32>
    %83 = arith.cmpi eq, %81, %82 : vector<1x8x128xi32>
    %cst_31 = arith.constant 0.000000e+00 : f32
    %84 = vector.broadcast %46 : f32 to vector<1x8x128xf32>
    %85 = vector.broadcast %cst_31 : f32 to vector<1x8x128xf32>
    %86 = arith.select %83, %84, %85 : vector<1x8x128xi1>, vector<1x8x128xf32>
    %c1_i32 = arith.constant 1 : i32
    %87 = vector.broadcast %c1_i32 : i32 to vector<1x8x128xi32>
    %88 = arith.cmpi eq, %81, %87 : vector<1x8x128xi32>
    %cst_32 = arith.constant 0.000000e+00 : f32
    %89 = vector.broadcast %62 : f32 to vector<1x8x128xf32>
    %90 = vector.broadcast %cst_32 : f32 to vector<1x8x128xf32>
    %91 = arith.select %88, %89, %90 : vector<1x8x128xi1>, vector<1x8x128xf32>
    %92 = arith.addf %86, %91 : vector<1x8x128xf32>
    %c2_i32 = arith.constant 2 : i32
    %93 = vector.broadcast %c2_i32 : i32 to vector<1x8x128xi32>
    %94 = arith.cmpi eq, %81, %93 : vector<1x8x128xi32>
    %cst_33 = arith.constant 0.000000e+00 : f32
    %95 = vector.broadcast %66 : f32 to vector<1x8x128xf32>
    %96 = vector.broadcast %cst_33 : f32 to vector<1x8x128xf32>
    %97 = arith.select %94, %95, %96 : vector<1x8x128xi1>, vector<1x8x128xf32>
    %98 = arith.addf %92, %97 : vector<1x8x128xf32>
    %c3_i32 = arith.constant 3 : i32
    %99 = vector.broadcast %c3_i32 : i32 to vector<1x8x128xi32>
    %100 = arith.cmpi eq, %81, %99 : vector<1x8x128xi32>
    %cst_34 = arith.constant 0.000000e+00 : f32
    %101 = vector.broadcast %80 : f32 to vector<1x8x128xf32>
    %102 = vector.broadcast %cst_34 : f32 to vector<1x8x128xf32>
    %103 = arith.select %100, %101, %102 : vector<1x8x128xi1>, vector<1x8x128xf32>
    %104 = arith.addf %98, %103 : vector<1x8x128xf32>
    %c0_35 = arith.constant 0 : index
    %c0_36 = arith.constant 0 : index
    %c0_37 = arith.constant 0 : index
    %105 = vector.load %arg8[%c0_35, %c0_36, %c0_37] : memref<1x8x128xf32, #tpu.memory_space<vmem>>, vector<1x8x128xf32>
    %106 = arith.addf %105, %104 : vector<1x8x128xf32>
    %c0_38 = arith.constant 0 : index
    %c0_39 = arith.constant 0 : index
    %c0_40 = arith.constant 0 : index
    %107 = vector.load %arg8[%c0_38, %c0_39, %c0_40] : memref<1x8x128xf32, #tpu.memory_space<vmem>>, vector<1x8x128xf32>
    tpu.vector_store %arg8[%c0_38, %c0_39, %c0_40], %106 {strides = array<i32>} : memref<1x8x128xf32, #tpu.memory_space<vmem>>, vector<1x8x128xf32>,
    return
  }
  func.func @transform_0(%arg0: i32, %arg1: i32) -> (i32, i32, i32) {
    %c0_i32 = arith.constant 0 : i32
    %c0_i32_0 = arith.constant 0 : i32
    return %arg0, %c0_i32, %arg1 : i32, i32, i32
  }
  func.func @transform_1(%arg0: i32, %arg1: i32) -> (i32, i32, i32) {
    %c0_i32 = arith.constant 0 : i32
    %c0_i32_0 = arith.constant 0 : i32
    return %arg0, %c0_i32, %arg1 : i32, i32, i32
  }
  func.func @transform_2(%arg0: i32, %arg1: i32) -> (i32, i32) {
    %c0_i32 = arith.constant 0 : i32
    %c0_i32_0 = arith.constant 0 : i32
    %c0_i32_1 = arith.constant 0 : i32
    return %c0_i32, %c0_i32_0 : i32, i32
  }
  func.func @transform_3(%arg0: i32, %arg1: i32) -> (i32, i32) {
    %c0_i32 = arith.constant 0 : i32
    %c0_i32_0 = arith.constant 0 : i32
    %c0_i32_1 = arith.constant 0 : i32
    return %c0_i32, %c0_i32_0 : i32, i32
  }
  func.func @transform_4(%arg0: i32, %arg1: i32) -> (i32, i32, i32) {
    %c0_i32 = arith.constant 0 : i32
    %c0_i32_0 = arith.constant 0 : i32
    return %arg0, %c0_i32, %arg1 : i32, i32, i32
  }
  func.func @transform_5(%arg0: i32, %arg1: i32) -> (i32, i32, i32) {
    %c0_i32 = arith.constant 0 : i32
    %c0_i32_0 = arith.constant 0 : i32
    return %arg0, %c0_i32, %arg1 : i32, i32, i32
  }
  func.func @transform_6(%arg0: i32, %arg1: i32) -> (i32, i32, i32) {
    %c0_i32 = arith.constant 0 : i32
    %c0_i32_0 = arith.constant 0 : i32
    %c0_i32_1 = arith.constant 0 : i32
    return %arg0, %c0_i32, %c0_i32_0 : i32, i32, i32
  }
}

</mosaic_0001>

<bundles_post_ra>
// kernel: tpu_custom_call.1
= control target key start
LH: loop header
LB: loop body
LE: loop exit
PB: predicated region body
PF: predicated region fallthrough
CT: control target
= control target key end

     0   :  { %s1482_s0 = inlined_call_operand.vmem [shape: f32[2,4,256], index: 0, kind: input, shape index: {}]   ;;  %s1483_s1 = inlined_call_operand.vmem [shape: s32[2,1,256], index: 1, kind: input, shape index: {}]   ;;  %s1484_s2 = inlined_call_operand.vmem [shape: f32[16,4], index: 2, kind: input, shape index: {}]   ;;  %s1485_s3 = inlined_call_operand.vmem [shape: f32[16,1], index: 3, kind: input, shape index: {}]   ;;  %s1486_s4 = inlined_call_operand.hbm [shape: f32[2,8,256], index: 4, kind: output, shape index: {0}]   ;;  %s1487_s5 = inlined_call_operand.hbm [shape: f32[2,8,256], index: 5, kind: output, shape index: {1}]   ;;  %s1488_s6 = inlined_call_operand.hbm [shape: f32[2,8,128], index: 6, kind: output, shape index: {2}]  }
   0x1   :  { %1490 = sst [smem:[#allocation9_spill]] %s1482_s0 }
   0x2   :  { %1491 = sst [smem:[#allocation10_spill]] %s1483_s1 }
   0x3   :  { %1492 = sst [smem:[#allocation11_spill]] %s1484_s2 }
   0x4   :  { %12 = vsyncpa [#allocation3], 0 }
   0x5   :  { %14 = vsyncpa [#allocation3 + $0x1], 0 }
   0x6   :  { %15 = vsyncpa [#allocation5], 0 }
   0x7   :  { %17 = vsyncpa [#allocation5 + $0x1], 0  ;;  %s1221_s21 = smov 0   ;;  %s1223_s22 = smov 0  }
   0x8   :  { %s1225_s23 = smov 0   ;;  %s1227_s24 = smov 0  }
   0x9   :  { %s1229_s25 = smov 0   ;;  %s1231_s26 = smov 0  }
   0xa LB: > { %s919_s27 = sadd.s32 4294967295, %s1178_s26   ;;  %s1489_s28 = sadd.s32 4294967294, %s1178_s26   ;;  %s1178_s26 = sphi %s1231_s26, %s23_s26   ;;  %s1174_s25 = sphi %s1229_s25, %s1503_s25   ;;  %s1170_s24 = sphi %s1227_s24, %s1502_s24   ;;  %s1166_s23 = sphi %s1225_s23, %s1501_s23   ;;  %s1162_s22 = sphi %s1223_s22, %s1500_s22   ;;  %s1158_s21 = sphi %s1221_s21, %s1499_s21  }
   0xb   : > { %s35_s29 = sadd.s32 1, %s1174_s25  ;;  %s142_s30 = sadd.s32 1, %s1166_s23 }
   0xc   : > { %p37_p0 = scmp.ge.s32.totalorder %s35_s29, 2  ;;  %p152_p1 = scmp.ne.s32.totalorder %s1166_s23, %s1162_s22 }
   0xd   : > { %p153_p2 = scmp.eq.s32.totalorder %s919_s27, 1  ;;  %p158_p3 = scmp.ne.s32.totalorder %s1162_s22, %s1158_s21 }
   0xe   : > { %s1505_s29 = smov (%p37_p0, %s35_s29), 0  ;;  %p159_p5 = scmp.eq.s32.totalorder %s1489_s28, 1 }
   0xf   : > { %p1263_p4 = por %p153_p2, %p152_p1  ;;  %s137_s8 = ssub.s32 %s1174_s25, %s1505_s29 }
  0x10   : > { %p923_p6 = scmp.ge.s32.totalorder %s1178_s26, 1  ;;  %p140_p7 = scmp.eq.s32.totalorder %s137_s8, 0 }
  0x11   : > { %p1272_p8 = por %p159_p5, %p158_p3  ;;  %p262_p9 = scmp.lt.s32.totalorder %s1178_s26, 3 }
  0x12   : > { %s1278_s10 = scalar_select %p140_p7, %s1166_s23, %s142_s30  }
  0x13   : > { %p263_p10 = pnand %p923_p6, %p262_p9 }
  0x14   : > { %p315_p11 = scmp.lt.s32.totalorder (!%p263_p10), %s1170_s24, 1  ;;  %s1495_s0 = sld [smem:[#allocation9_spill]] (!%p263_p10) }
  0x15   : > { %266 = sbr.rel (%p263_p10) target bundleno = 522 (0x20a), region = 36  ;;  %s1496_s2 = sld [smem:[#allocation11_spill]] (!%p263_p10) }
  0x16   : > { %s1497_s1 = sld [smem:[#allocation10_spill]] (!%p263_p10)  ;;  %s1387_s20 = sand.u32 (!%p263_p10), 1, %s919_s27  }
  0x17   : > { %s948_s30 = sshll.u32 (!%p263_p10), %s1170_s24, 8  ;;  %s714_s28 = scalar_lea.sflag (!%p263_p10), [#allocation5], %s1387_s20 }
  0x18   : > { %s1183_s27 = smov (!%p263_p10), [#allocation4]  }
  0x1a   : > { %v1180_v0 = vmov 0.0   ;;  %v344_v1 = vld [vmem:[%s1485_s3] sm:$0xff]  ;;  %s316_s13 = scalar_select %p315_p11, %s1170_s24, 1  ;;  %v1181_v2 = vmov 0   ;;  %v345_v3 = vld [vmem:[%s1485_s3 + $0x8] sm:$0xff]  ;;  %vm365_vm0 = vcmask 1043456   ;;  %v451_v8 = vlaneseq }
  0x1b   : > { %434 = vmatprep.mubr.f32.mxu0 %v1180_v0  ;;  %440 = vmatprep.mubr.f32.mxu1 %v1180_v0  ;;  %v342_v6 = vld [vmem:[%s1496_s2] sm:$0xff]  ;;  %vm358_vm1 = vcmask 31744   ;;  %v343_v7 = vld [vmem:[%s1496_s2 + $0x8] sm:$0xff]  ;;  %vm541_vm3 = vcmask 1040384  }
  0x1c   : > { %1028 = vset.pattern.permute.xlu0 %v1181_v2  ;;  %s947_s14 = sshll.u32 %s316_s13, 3  ;;  %s929_s12 = sshll.u32 %s316_s13, 1  ;;  %v1303_v9 = vshrl.u32 %v451_v8, 7 }
  0x1d   : > { %348 = vperm.xlu0 %1028, %v344_v1   ;;  %s322_s19 = scalar_lea.vmem %s1495_s0, %s947_s14  ;;  %s331_s16 = scalar_lea.vmem %s1497_s1, %s929_s12 }
  0x1e   : > { %v340_v4 = vld [vmem:[%s322_s19] sm:$0xff]  ;;  %v1308_v11 = vsub.s32 0, %v1303_v9  ;;  %v1311_v12 = vsub.s32 1, %v1303_v9  ;;  %s1330_s13 = sand.u32 1, %s1162_s22   ;;  %s1393_s12 = scalar_lea.hbm %s1487_s5, %s948_s30 }
  0x1f   : > { %v357_v5 = vcombine.high %v340_v4, %v340_v4  ;;  %v1305_v10 = vld [vmem:[%s331_s16] sm:$0x3]  ;;  %s924_s17 = sshll.u32 %s1330_s13, 4  ;;  %s1050_s1 = sshll.u32 %s1183_s27, 4  ;;  %s1051_s1 = int_to_ptr.vmem [resolvable:$false] %s1050_s1 }
  0x20   : > { %vm453_vm2 = vcmp.ge.s32.totalorder %v1305_v10, 0  ;;  %s1333_s18 = scalar_lea.vmem [#allocation4], %s924_s17  ;;  %s1336_s19 = scalar_lea.vmem [#allocation2], %s924_s17 }
  0x21   : > { %353 = vperm.xlu0 %1028, %v345_v3   ;;  %930 = vmatprep.subr.msk.mxu0 %vm365_vm0, %v357_v5  ;;  %v1315_v13 = vsel %vm453_vm2, 1.0, %v1180_v0  ;;  %s751_s14 = sshll.u32 %s1333_s18, 4  ;;  %s1399_s17 = scalar_lea.hbm %s1486_s4, %s948_s30  ;;  %s752_s14 = int_to_ptr.vmem [resolvable:$true] %s751_s14 }
  0x22   : > { %950 = vmatprep.subr.msk.mxu1 %vm365_vm0, %v357_v5  ;;  %931 = vmatpush1.msk.msra.mxu0 %vm365_vm0, %v340_v4  ;;  %v1319_v14 = vrot.slane %v1315_v13, %v1308_v11  ;;  %v1323_v15 = vrot.slane %v1315_v13, %v1311_v12  ;;  %v1345_v5 = vrot.slane %v1305_v10, %v1308_v11  ;;  %s1046_s0 = scalar_lea.vmem %s752_s14, 256  ;;  %s1052_s2 = scalar_lea.vmem %s1051_s1, 512 }
  0x23   : > { %951 = vmatpush1.msk.msra.mxu1 %vm365_vm0, %v340_v4  ;;  %932 = vmatmul.mubr.msk.f32.vlgmr.msra.gmra.mxu0 %vm358_vm1, %v342_v6  ;;  %p1047_p12 = scmp.ne.s32.totalorder %s752_s14, %s1046_s0  ;;  %p1053_p1 = scmp.lt.s32.totalorder %s752_s14, %s1051_s1 }
  0x24   : > { %933 = vmatmul.mubr.msk.f32.vlgmr.msra.gmra.mxu1 %vm358_vm1, %v343_v7  ;;  %v606_v16 = vsel %vm541_vm3, %v1319_v14, 0.0  ;;  %v607_v17 = vsel %vm541_vm3, %v1323_v15, 0.0  ;;  %v1349_v7 = vrot.slane %v1305_v10, %v1311_v12  ;;  %vm464_vm9 = vcmp.eq.s32.totalorder %v1303_v9, %v1345_v5  ;;  %p1054_p2 = scmp.lt.s32.totalorder %s1052_s2, %s1046_s0 }
  0x25   : > { %v608_v18 = vadd.f32 %v607_v17, %v606_v16  ;;  %p1048_p13 = pnand %p1047_p12, %p1263_p4 }
  0x26   : > { %vm465_vm11 = vcmp.eq.s32.totalorder %v1303_v9, %v1349_v7  ;;  %p1055_p3 = por %p1054_p2, %p1053_p1 }
  0x27   : > { %p1049_p0 = pneg %p1048_p13 }
  0x29   : > { %p1056_p5 = pnand %p1055_p3, %p1049_p0 }
  0x40   : > { %609 = vadd.xlane.f32.xlu0 %v608_v18 }
  0x98   : > { %v349_v19 = vpop.permute.xlu0 %348 }
  0x9c   : > { %v354_v20 = vpop.permute.xlu0 %353 }
  0xe3   : > { %v436_v21 = vpop.f32.mrf.mxu0 }
  0xe4   : > { %v442_v22 = vpop.f32.mrf.mxu1  ;;  %v437_v23 = vadd.f32 %v436_v21, %v349_v19 }
  0xe5   : > { %v443_v24 = vadd.f32 %v442_v22, %v354_v20  ;;  %v438_v25 = vpop.f32.mrf.mxu0 }
  0xe6   : > { %v444_v26 = vpop.f32.mrf.mxu1  ;;  %v478_v27 = vrot.slane %v437_v23, 4  ;;  %v439_v29 = vadd.f32 %v438_v25, %v349_v19  ;;  %447 = vst [vmem:[%s1336_s19] sm:$0xff] %v437_v23 }
  0xe7   : > { %v466_v28 = vrot.slane %v443_v24, 4  ;;  %v445_v30 = vadd.f32 %v444_v26, %v354_v20  ;;  %449 = vst [vmem:[%s1333_s18] sm:$0xff] %v443_v24 }
  0xe8   : > { %v479_v31 = vmax.f32 %v437_v23, %v478_v27  ;;  %v484_v33 = vrot.slane %v439_v29, 4  ;;  %448 = vst [vmem:[%s1336_s19 + $0x8] sm:$0xff] %v439_v29 }
  0xe9   : > { %v467_v32 = vmax.f32 %v443_v24, %v466_v28  ;;  %v472_v34 = vrot.slane %v445_v30, 4  ;;  %450 = vst [vmem:[%s1333_s18 + $0x8] sm:$0xff] %v445_v30 }
  0xea   : > { %v480_v35 = vrot.slane %v479_v31, 2  ;;  %v485_v37 = vmax.f32 %v439_v29, %v484_v33 }
  0xeb   : > { %v468_v36 = vrot.slane %v467_v32, 2  ;;  %v473_v38 = vmax.f32 %v445_v30, %v472_v34 }
  0xec   : > { %v481_v39 = vmax.f32 %v479_v31, %v480_v35  ;;  %v486_v41 = vrot.slane %v485_v37, 2 }
  0xed   : > { %v469_v40 = vmax.f32 %v467_v32, %v468_v36  ;;  %v474_v42 = vrot.slane %v473_v38, 2 }
  0xee   : > { %v482_v43 = vrot.slane %v481_v39, 1  ;;  %v487_v45 = vmax.f32 %v485_v37, %v486_v41 }
  0xef   : > { %v470_v44 = vrot.slane %v469_v40, 1  ;;  %v475_v46 = vmax.f32 %v473_v38, %v474_v42 }
  0xf0   : > { %v483_v47 = vmax.f32 %v481_v39, %v482_v43  ;;  %v488_v49 = vrot.slane %v487_v45, 1 }
  0xf1   : > { %v471_v48 = vmax.f32 %v469_v40, %v470_v44  ;;  %v476_v50 = vrot.slane %v475_v46, 1 }
  0xf2   : > { %v490_v51 = vsub.f32 %v437_v23, %v483_v47  ;;  %v489_v53 = vmax.f32 %v487_v45, %v488_v49 }
  0xf3   : > { %v554_v52 = vsub.f32 %v443_v24, %v471_v48  ;;  %vm618_vm4 = vcmp.eq.f32.partialorder %v443_v24, %v471_v48  ;;  %v477_v54 = vmax.f32 %v475_v46, %v476_v50 }
  0xf4   : > { %v492_v55 = vmul.f32 1.442695, %v490_v51  ;;  %v620_v57 = vsel %vm618_vm4, %v1303_v9, 8  ;;  %v491_v58 = vsub.f32 %v439_v29, %v489_v53  ;;  %v512_v10 = vsel %vm464_vm9, %v490_v51, 0.0 }
  0xf5   : > { %v556_v56 = vmul.f32 1.442695, %v554_v52  ;;  %v555_v59 = vsub.f32 %v445_v30, %v477_v54  ;;  %vm619_vm5 = vcmp.eq.f32.partialorder %v445_v30, %v477_v54  ;;  %v622_v61 = vrot.slane %v620_v57, 4 }
  0xf6   : > { %1030 = vpow2.f32 %v492_v55  ;;  %v621_v60 = vsel %vm619_vm5, %v1303_v9, 8  ;;  %v494_v62 = vmul.f32 1.442695, %v491_v58  ;;  %v513_v29 = vsel %vm465_vm11, %v491_v58, 0.0 }
  0xf7   : > { %1032 = vpow2.f32 %v556_v56  ;;  %v558_v63 = vmul.f32 1.442695, %v555_v59  ;;  %v631_v1 = vrot.slane %v621_v60, 4  ;;  %vm623_vm7 = vcmp.lt.s32.totalorder %v620_v57, %v622_v61 }
  0xf8   : > { %1034 = vpow2.f32 %v494_v62  ;;  %v624_v3 = vsel %vm623_vm7, %v620_v57, %v622_v61  ;;  %v514_v33 = vrot.slane %v512_v10, 4  ;;  %v576_v36 = vsel %vm464_vm9, %v554_v52, 0.0 }
  0xf9   : > { %1036 = vpow2.f32 %v558_v63  ;;  %vm632_vm6 = vcmp.lt.s32.totalorder %v621_v60, %v631_v1  ;;  %v625_v6 = vrot.slane %v624_v3, 2  ;;  %v577_v39 = vsel %vm465_vm11, %v555_v59, 0.0 }
  0xfa   : > { %v633_v2 = vsel %vm632_vm6, %v621_v60, %v631_v1  ;;  %v520_v41 = vrot.slane %v513_v29, 4  ;;  %v578_v46 = vrot.slane %v576_v36, 4  ;;  %v515_v48 = vadd.f32 %v514_v33, %v512_v10 }
  0xfb   : > { %v634_v4 = vrot.slane %v633_v2, 2  ;;  %vm626_vm10 = vcmp.lt.s32.totalorder %v624_v3, %v625_v6  ;;  %v584_v50 = vrot.slane %v577_v39, 4  ;;  %v1182_v55 = vmov 1966171168  }
  0xfc   : > { %v627_v28 = vsel %vm626_vm10, %v624_v3, %v625_v6  ;;  %v650_v56 = vunpack.c.l.s4 %v1182_v55  ;;  %v521_v58 = vadd.f32 %v520_v41, %v513_v29  ;;  %v579_v59 = vadd.f32 %v578_v46, %v576_v36 }
  0xfd   : > { %vm635_vm8 = vcmp.lt.s32.totalorder %v633_v2, %v634_v4  ;;  %v628_v40 = vrot.slane %v627_v28, 1  ;;  %v516_v60 = vrot.slane %v515_v48, 2  ;;  %v585_v62 = vadd.f32 %v584_v50, %v577_v39 }
  0xfe   : > { %v636_v22 = vsel %vm635_vm8, %v633_v2, %v634_v4  ;;  %v522_v1 = vrot.slane %v521_v58, 2  ;;  %v580_v2 = vrot.slane %v579_v59, 2  ;;  %v651_v3 = vunpack.c.0.s8 %v650_v56 }
  0xff   : > { %v637_v32 = vrot.slane %v636_v22, 1  ;;  %vm629_vm13 = vcmp.lt.s32.totalorder %v627_v28, %v628_v40  ;;  %v517_v4 = vadd.f32 %v516_v60, %v515_v48  ;;  %v586_v6 = vrot.slane %v585_v62, 2 }
 0x100   : > { %v630_v63 = vsel %vm629_vm13, %v627_v28, %v628_v40 }
 0x101   : > { %vm638_vm12 = vcmp.lt.s32.totalorder %v636_v22, %v637_v32  ;;  %vm640_vm15 = vcmp.eq.s32.totalorder %v630_v63, %v1345_v5 }
 0x102   : > { %v639_v54 = vsel %vm638_vm12, %v636_v22, %v637_v32  ;;  %v518_v22 = vrot.slane %v517_v4, 1 }
 0x103   : > { %v1031_v16 = vpop.eup %1030  ;;  %vm641_vm14 = vcmp.eq.s32.totalorder %v639_v54, %v1349_v7 }
 0x104   : > { %v1033_v17 = vpop.eup %1032  ;;  %v496_v18 = vrot.slane %v1031_v16, 4 }
 0x105   : > { %v560_v19 = vrot.slane %v1033_v17, 4  ;;  %v1035_v20 = vpop.eup %1034 }
 0x106   : > { %v497_v21 = vadd.f32 %v1031_v16, %v496_v18  ;;  %v1037_v23 = vpop.eup %1036  ;;  %v502_v24 = vrot.slane %v1035_v20, 4  ;;  %v936_v16 = vsel %vm641_vm14, 1.0, %v1180_v0  ;;  %v523_v18 = vadd.f32 %v522_v1, %v521_v58 }
 0x107   : > { %v561_v25 = vadd.f32 %v1033_v17, %v560_v19  ;;  %v566_v27 = vrot.slane %v1037_v23, 4  ;;  %v935_v17 = vsel %vm640_vm15, 1.0, %v1180_v0  ;;  %v581_v19 = vadd.f32 %v580_v2, %v579_v59 }
 0x108   : > { %v498_v26 = vrot.slane %v497_v21, 2  ;;  %v503_v30 = vadd.f32 %v1035_v20, %v502_v24  ;;  %v648_v20 = vcombine.low %v935_v17, %v936_v16  ;;  %v524_v10 = vrot.slane %v523_v18, 1 }
 0x109   : > { %v562_v31 = vrot.slane %v561_v25, 2  ;;  %v567_v35 = vadd.f32 %v1037_v23, %v566_v27  ;;  %v587_v23 = vadd.f32 %v586_v6, %v585_v62  ;;  %v582_v24 = vrot.slane %v581_v19, 1 }
 0x10a   : > { %v499_v34 = vadd.f32 %v498_v26, %v497_v21  ;;  %v504_v37 = vrot.slane %v503_v30, 2  ;;  %v654_v21 = vsub.s32 %v651_v3, %v1303_v9  ;;  %v519_v27 = vadd.f32 %v518_v22, %v517_v4 }
 0x10b   : > { %v563_v38 = vadd.f32 %v562_v31, %v561_v25  ;;  %v568_v43 = vrot.slane %v567_v35, 2  ;;  %v588_v28 = vrot.slane %v587_v23, 1  ;;  %v525_v33 = vadd.f32 %v524_v10, %v523_v18 }
 0x10c   : > { %v500_v42 = vrot.slane %v499_v34, 1  ;;  %v505_v44 = vadd.f32 %v504_v37, %v503_v30  ;;  %v655_v25 = vrot.slane %v648_v20, %v654_v21 }
 0x10d   : > { %v564_v45 = vrot.slane %v563_v38, 1  ;;  %v569_v49 = vadd.f32 %v568_v43, %v567_v35  ;;  %v589_v9 = vadd.f32 %v588_v28, %v587_v23 }
 0x10e   : > { %v501_v47 = vadd.f32 %v500_v42, %v499_v34  ;;  %v506_v51 = vrot.slane %v505_v44, 1  ;;  %v583_v34 = vadd.f32 %v582_v24, %v581_v19  ;;  %v662_v35 = vrot.slane %v655_v25, %v654_v21 }
 0x10f   : > { %v565_v52 = vadd.f32 %v564_v45, %v563_v38  ;;  %v570_v53 = vrot.slane %v569_v49, 1 }
 0x110   : > { %1038 = vlog2.f32 %v501_v47  ;;  %v507_v57 = vadd.f32 %v506_v51, %v505_v44  ;;  %v664_v42 = vmul.f32 %v1315_v13, %v662_v35 }
 0x111   : > { %1040 = vlog2.f32 %v565_v52  ;;  %v571_v61 = vadd.f32 %v570_v53, %v569_v49 }
 0x112   : > { %1042 = vlog2.f32 %v507_v57  ;;  %v669_v49 = vrot.slane %v664_v42, %v1308_v11  ;;  %v673_v50 = vrot.slane %v664_v42, %v1311_v12 }
 0x113   : > { %1044 = vlog2.f32 %v571_v61 }
 0x114   : > { %v676_v51 = vsel %vm541_vm3, %v669_v49, 0.0  ;;  %v677_v52 = vsel %vm541_vm3, %v673_v50, 0.0 }
 0x115   : > { %v678_v53 = vadd.f32 %v677_v52, %v676_v51 }
 0x11d   : > { %v1039_v7 = vpop.eup %1038 }
 0x11e   : > { %v1041_v26 = vpop.eup %1040  ;;  %v509_v5 = vmul.f32 0.6931472, %v1039_v7 }
 0x11f   : > { %v573_v29 = vmul.f32 0.6931472, %v1041_v26  ;;  %v1043_v30 = vpop.eup %1042 }
 0x120   : > { %v526_v31 = vsub.f32 %v509_v5, %v519_v27  ;;  %v1045_v32 = vpop.eup %1044  ;;  %v511_v0 = vmul.f32 0.6931472, %v1043_v30 }
 0x121   : > { %v575_v36 = vmul.f32 0.6931472, %v1045_v32  ;;  %v590_v39 = vsub.f32 %v573_v29, %v583_v34 }
 0x122   : > { %v527_v37 = vsub.f32 %v511_v0, %v525_v33  ;;  %v539_v38 = vmul.f32 %v1319_v14, %v526_v31 }
 0x123   : > { %v591_v40 = vsub.f32 %v575_v36, %v589_v9  ;;  %v592_v46 = vmul.f32 %v590_v39, %v1319_v14 }
 0x124   : > { %v540_v41 = vmul.f32 %v1323_v15, %v527_v37  ;;  %v542_v44 = vsel %vm541_vm3, %v539_v38, 0.0 }
 0x125   : > { %v593_v43 = vmul.f32 %v591_v40, %v1323_v15  ;;  %v594_v13 = vsel %vm541_vm3, %v592_v46, 0.0 }
 0x126   : > { %v543_v45 = vsel %vm541_vm3, %v540_v41, 0.0 }
 0x127   : > { %v544_v47 = vadd.f32 %v543_v45, %v542_v44  ;;  %v595_v48 = vsel %vm541_vm3, %v593_v43, 0.0 }
 0x128   : > { %v596_v15 = vadd.f32 %v595_v48, %v594_v13 }
 0x129   : > { %545 = vadd.xlane.f32.xlu1 %v544_v47 }
 0x12d   : > { %597 = vadd.xlane.f32.xlu1 %v596_v15 }
 0x131   : > { %679 = vadd.xlane.f32.xlu1 %v678_v53 }
 0x132   : > { %1059 = shalt.err (!%p1056_p5)
}
 0x133   : > { %s1060_s18 = scalar_lea.hbm %s1393_s12, 256  ;;  %s1064_s11 = scalar_lea.hbm %s1487_s5, 512 }
 0x134   : > { %p1061_p6 = scmp.ne.s32.totalorder %s1393_s12, %s1060_s18  ;;  %p1065_p10 = scmp.lt.s32.totalorder %s1393_s12, %s1487_s5 }
 0x135   : > { %p1066_p11 = scmp.lt.s32.totalorder %s1064_s11, %s1060_s18 }
 0x136   : > { %p1062_p7 = pnand %p1061_p6, %p1263_p4 }
 0x137   : > { %p1067_p12 = por %p1066_p11, %p1065_p10 }
 0x138   : > { %p1063_p9 = pneg %p1062_p7 }
 0x13a   : > { %p1068_p13 = pnand %p1067_p12, %p1063_p9 }
 0x13c   : > { %1071 = shalt.err (!%p1068_p13)
}
 0x13d   : > { %961 = dma.vmem_to_hbm [thread:$0]  (%p1263_p4), %s752_s14, 256, %s1393_s12, %s714_s28  }
 0x13e   : > { %s735_s0 = sshll.u32 %s1336_s19, 4  ;;  %s709_s1 = scalar_lea.sflag [#allocation3], %s1330_s13  ;;  %s736_s0 = int_to_ptr.vmem [resolvable:$true] %s735_s0 }
 0x13f   : > { %s1072_s2 = scalar_lea.vmem %s736_s0, 256  ;;  %s1184_s27 = smov [#allocation2]  }
 0x140   : > { %p1073_p0 = scmp.ne.s32.totalorder %s736_s0, %s1072_s2  ;;  %s1076_s18 = sshll.u32 %s1184_s27, 4  ;;  %s1077_s18 = int_to_ptr.vmem [resolvable:$false] %s1076_s18 }
 0x141   : > { %s1078_s30 = scalar_lea.vmem %s1077_s18, 512  ;;  %p1079_p3 = scmp.lt.s32.totalorder %s736_s0, %s1077_s18 }
 0x142   : > { %p1074_p1 = pnand %p1073_p0, %p1263_p4  ;;  %p1080_p5 = scmp.lt.s32.totalorder %s1078_s30, %s1072_s2 }
 0x144   : > { %p1075_p2 = pneg %p1074_p1  ;;  %p1081_p6 = por %p1080_p5, %p1079_p3 }
 0x146   : > { %p1082_p7 = pnand %p1081_p6, %p1075_p2 }
 0x148   : > { %1085 = shalt.err (!%p1082_p7)
}
 0x149   : > { %s1086_s19 = scalar_lea.hbm %s1399_s17, 256  ;;  %s1090_s8 = scalar_lea.hbm %s1486_s4, 512 }
 0x14a   : > { %p1087_p9 = scmp.ne.s32.totalorder %s1399_s17, %s1086_s19  ;;  %p1091_p12 = scmp.lt.s32.totalorder %s1399_s17, %s1486_s4 }
 0x14b   : > { %p1092_p13 = scmp.lt.s32.totalorder %s1090_s8, %s1086_s19 }
 0x14c   : > { %p1088_p10 = pnand %p1087_p9, %p1263_p4 }
 0x14d   : > { %p1093_p0 = por %p1092_p13, %p1091_p12 }
 0x14e   : > { %p1089_p11 = pneg %p1088_p10 }
 0x150   : > { %p1094_p1 = pnand %p1093_p0, %p1089_p11 }
 0x152   : > { %1097 = shalt.err (!%p1094_p1)
}
 0x153   : > { %960 = dma.vmem_to_hbm [thread:$0]  (%p1263_p4), %s736_s0, 256, %s1399_s17, %s709_s1   ;;  %v610_v11 = vpop.xlane.xlu0 %609  ;;  %v689_v24 = vand.u32 127, %v451_v8 }
 0x154   : > { %v611_v12 = vrot.slane %v610_v11, 4  ;;  %s926_s0 = sshll.u32 %s1330_s13, 3  ;;  %s944_s27 = sshll.u32 %s1170_s24, 7 }
 0x155   : > { %vm690_vm0 = vcmp.eq.s32.totalorder %v689_v24, 0  ;;  %vm693_vm1 = vcmp.eq.s32.totalorder %v689_v24, 1  ;;  %vm697_vm2 = vcmp.eq.s32.totalorder %v689_v24, 2  ;;  %vm701_vm3 = vcmp.eq.s32.totalorder %v689_v24, 3  ;;  %s313_s18 = scalar_lea.vmem [#allocation6], %s926_s0  ;;  %s762_s12 = scalar_lea.hbm %s1488_s6, %s944_s27 }
 0x156   : > { %v612_v14 = vadd.f32 %v611_v12, %v610_v11  ;;  %s764_s30 = sshll.u32 %s313_s18, 4  ;;  %s1185_s8 = smov [#allocation6]   ;;  %s765_s30 = int_to_ptr.vmem [resolvable:$true] %s764_s30 }
 0x157   : > { %s1098_s14 = scalar_lea.vmem %s765_s30, 128  ;;  %s1102_s11 = sshll.u32 %s1185_s8, 4  ;;  %s1103_s11 = int_to_ptr.vmem [resolvable:$false] %s1102_s11 }
 0x158   : > { %v613_v57 = vrot.slane %v612_v14, 2  ;;  %p1099_p2 = scmp.ne.s32.totalorder %s765_s30, %s1098_s14  ;;  %s1104_s15 = scalar_lea.vmem %s1103_s11, 256 }
 0x159   : > { %p1105_p6 = scmp.lt.s32.totalorder %s765_s30, %s1103_s11  ;;  %p1106_p7 = scmp.lt.s32.totalorder %s1104_s15, %s1098_s14 }
 0x15a   : > { %v614_v63 = vadd.f32 %v613_v57, %v612_v14  ;;  %p1100_p3 = pnand %p1099_p2, %p1263_p4 }
 0x15b   : > { %p1107_p9 = por %p1106_p7, %p1105_p6 }
 0x15c   : > { %v615_v18 = vrot.slane %v614_v63, 1  ;;  %p1101_p5 = pneg %p1100_p3 }
 0x15e   : > { %v616_v23 = vadd.f32 %v615_v18, %v614_v63  ;;  %p1108_p10 = pnand %p1107_p9, %p1101_p5 }
 0x1b2   : > { %v546_v54 = vpop.xlane.xlu1 %545 }
 0x1b3   : > { %v547_v55 = vrot.slane %v546_v54, 4 }
 0x1b5   : > { %v548_v56 = vadd.f32 %v547_v55, %v546_v54 }
 0x1b6   : > { %v598_v58 = vpop.xlane.xlu1 %597 }
 0x1b7   : > { %v549_v59 = vrot.slane %v548_v56, 2  ;;  %v599_v60 = vrot.slane %v598_v58, 4 }
 0x1b9   : > { %v600_v61 = vadd.f32 %v599_v60, %v598_v58  ;;  %v550_v62 = vadd.f32 %v549_v59, %v548_v56 }
 0x1ba   : > { %v680_v1 = vpop.xlane.xlu1 %679 }
 0x1bb   : > { %v601_v2 = vrot.slane %v600_v61, 2  ;;  %v681_v3 = vrot.slane %v680_v1, 4  ;;  %v551_v4 = vrot.slane %v550_v62, 1 }
 0x1bd   : > { %v682_v6 = vadd.f32 %v681_v3, %v680_v1  ;;  %v552_v16 = vadd.f32 %v551_v4, %v550_v62  ;;  %v602_v17 = vadd.f32 %v601_v2, %v600_v61 }
 0x1bf   : > { %v683_v19 = vrot.slane %v682_v6, 2  ;;  %952 = vpush %v552_v16  ;;  %v603_v20 = vrot.slane %v602_v17, 1 }
 0x1c1   : > { %v684_v21 = vadd.f32 %v683_v19, %v682_v6  ;;  %v604_v22 = vadd.f32 %v603_v20, %v602_v17 }
 0x1c3   : > { %954 = vpush %v604_v22  ;;  %v685_v7 = vrot.slane %v684_v21, 1 }
 0x1c4   : > { %956 = vpush %v616_v23 }
 0x1c5   : > { %v686_v10 = vadd.f32 %v685_v7, %v684_v21 }
 0x1c7   : > { %958 = vpush %v686_v10 }
 0x1f0   : > { %s953_s17 = spop %952 }
 0x1f1   : > { %v691_v25 = vstv %s953_s17 }
 0x1f2   : > { %v692_v5 = vsel %vm690_vm0, %v691_v25, 0.0 }
 0x1f4   : > { %s955_s16 = spop %954 }
 0x1f5   : > { %v694_v26 = vstv %s955_s16  ;;  %s957_s1 = spop %956 }
 0x1f6   : > { %v695_v27 = vsel %vm693_vm1, %v694_v26, 0.0  ;;  %v698_v28 = vstv %s957_s1 }
 0x1f7   : > { %v696_v29 = vadd.f32 %v695_v27, %v692_v5  ;;  %v699_v30 = vsel %vm697_vm2, %v698_v28, 0.0 }
 0x1f8   : > { %s959_s2 = spop %958 }
 0x1f9   : > { %v700_v31 = vadd.f32 %v699_v30, %v696_v29  ;;  %v702_v8 = vstv %s959_s2 }
 0x1fa   : > { %v703_v32 = vsel %vm701_vm3, %v702_v8, 0.0 }
 0x1fb   : > { %v704_v0 = vadd.f32 %v703_v32, %v700_v31 }
 0x1fd   : > { %707 = vst [vmem:[%s313_s18] sm:$0xff] %v704_v0 }
 0x1fe   : > { %1111 = shalt.err (!%p1108_p10)
}
 0x1ff   : > { %s1112_s24 = scalar_lea.hbm %s762_s12, 128  ;;  %s1116_s0 = scalar_lea.hbm %s1488_s6, 256 }
 0x200   : > { %p1113_p11 = scmp.ne.s32.totalorder %s762_s12, %s1112_s24  ;;  %p1117_p0 = scmp.lt.s32.totalorder %s762_s12, %s1488_s6 }
 0x201   : > { %p1118_p1 = scmp.lt.s32.totalorder %s1116_s0, %s1112_s24 }
 0x202   : > { %p1114_p12 = pnand %p1113_p11, %p1263_p4 }
 0x203   : > { %p1119_p2 = por %p1118_p1, %p1117_p0 }
 0x204   : > { %p1115_p13 = pneg %p1114_p12 }
 0x206   : > { %p1120_p3 = pnand %p1119_p2, %p1115_p13 }
 0x208   : > { %1123 = shalt.err (!%p1120_p3)
}
 0x209   : > { %962 = dma.vmem_to_hbm [thread:$0]  (%p1263_p4), %s765_s30, 128, %s762_s12, %s714_s28  }
 0x20a PF: > { %p976_p5 = scmp.ge.s32.totalorder %s1178_s26, 2  ;;  %s776_s27 = sand.u32 1, %s1158_s21  }
 0x20b   : > { %s777_s18 = scalar_lea.sflag [#allocation3], %s776_s27 }
 0x20c   : > { %p967_p6 = pnand %p976_p5, %p1272_p8 }
 0x20e   : > { %p968_p7 = pneg %p967_p6 }
 0x210   : > { %1149 = dma.done.wait (%p968_p7), %s777_s18, 256  }
 0x211   : > { %1151 = vsyncadd (%p968_p7), %s777_s18, 4294967040  ;;  %s1498_s19 = sadd.s32 4294967294, %s1178_s26  }
 0x212   : > { %s785_s13 = sand.u32 1, %s1498_s19  }
 0x213   : > { %s786_s14 = scalar_lea.sflag [#allocation5], %s785_s13 }
 0x214   : > { %1153 = dma.done.wait (%p968_p7), %s786_s14, 384  }
 0x215   : > { %1155 = vsyncadd (%p968_p7), %s786_s14, 4294966912  ;;  %s23_s26 = sadd.s32 1, %s1178_s26   ;;  %s1499_s21 = smov %s1162_s22 }
 0x216   : > { %p20_p4 = scmp.ge.s32.totalorder %s23_s26, 4   ;;  %s1500_s22 = smov %s1166_s23 }
 0x217   : > { %s1501_s23 = smov %s1278_s10  ;;  %s1502_s24 = smov %s1174_s25 }
 0x218   : > { %s1503_s25 = smov %s1505_s29  ;;  %22 = sbr.rel (!%p20_p4) target bundleno = 10 (0xa), region = 110 }
 0x21d   :  { %800 = vsyncpa [#allocation3], 1 }
 0x21e   :  { %802 = vsyncpa [#allocation3 + $0x1], 1 }
 0x21f   :  { %803 = vsyncpa [#allocation5], 1 }
 0x220   :  { %805 = vsyncpa [#allocation5 + $0x1], 1 }

</bundles_post_ra>
